<compile_context>
chip_gen: v7x
topology: tpu7x:2x2x1
jax: 0.10.0
libtpu: 0.0.40
codegen_flags: <defaults>
</compile_context>

<pallas_src>
import jax
import jax.numpy as jnp
from jax import lax
from jax.experimental import pallas as pl
from jax.experimental.pallas import tpu as pltpu


# ---------------------------------------------------------------------------
# Kernels
# ---------------------------------------------------------------------------
def birnn_fwd_kernel(emb_ref, w_ih_ref, b_ih_ref, w_hh_ref, h_ref, xproj_scr):
    """grid = (batch_tiles, time_chunks).

    Per grid step: one big MXU matmul projects the whole (Tt*tb, E) input
    chunk (independent of h, so off the serial chain), then an unrolled
    Tt-step tanh recurrence updates the hidden state, which is carried in the
    output block across the time-chunk axis.
    """
    c = pl.program_id(1)
    tb = h_ref.shape[0]
    tt = xproj_scr.shape[0] // tb

    @pl.when(c == 0)
    def _():
        h_ref[...] = jnp.zeros_like(h_ref)

    # Chunk input projection: x_proj = X_chunk @ W_ih + b  (bias folded here).
    xproj_scr[...] = (
        jnp.dot(emb_ref[...], w_ih_ref[...],
                preferred_element_type=jnp.float32)
        + b_ih_ref[...])

    w_hh = w_hh_ref[...]

    def step(t, h):
        xp = xproj_scr[pl.ds(t * tb, tb), :]
        return jnp.tanh(
            jnp.dot(h, w_hh, preferred_element_type=jnp.float32) + xp)

    # Serial critical path: one (tb,H)@(H,H) matmul + tanh per timestep.
    h_ref[...] = lax.fori_loop(0, tt, step, h_ref[...], unroll=True)


def head_kernel(h_fwd_ref, emb_last_ref, w_ih_b_ref, b_b_ref,
                w_out_f_ref, w_out_b_ref, b_out_ref, out_ref):
    """Backward direction's first step (== its value at the last position)
    plus the output linear on concat([h_fwd, h_bwd]) as a split matmul."""
    h_bwd = jnp.tanh(
        jnp.dot(emb_last_ref[...], w_ih_b_ref[...],
                preferred_element_type=jnp.float32)
        + b_b_ref[...])
    out_ref[...] = (
        jnp.dot(h_fwd_ref[...], w_out_f_ref[...],
                preferred_element_type=jnp.float32)
        + jnp.dot(h_bwd, w_out_b_ref[...],
                  preferred_element_type=jnp.float32)
        + b_out_ref[...])


# ---------------------------------------------------------------------------
# Wrapper
# ---------------------------------------------------------------------------
def _round_up(x, m):
    return ((x + m - 1) // m) * m


def _pad_to(x, shape):
    return jnp.pad(x, [(0, s - d) for d, s in zip(x.shape, shape)])


def _largest_divisor_leq(n, cap):
    cap = max(1, min(n, cap))
    for d in range(cap, 0, -1):
        if n % d == 0:
            return d
    return 1


@jax.jit
def rnn_forward(x_ids, params):
    """x_ids: (B, T) int32 token ids. Returns logits (B, O) float32."""
    B, T = x_ids.shape
    E = params["emb"].shape[1]
    H = params["w_hh_f"].shape[0]
    O = params["b_out"].shape[-1]
    f32 = jnp.float32

    # vreg / MXU geometry: sublane-full batch, lane-dense feature dims.
    E_pad = _round_up(E, 128)
    H_pad = _round_up(H, 128)
    O_pad = _round_up(O, 128)

    # Batch tiling: cap at 256 rows (MXU M-dim), and split into >=2 tiles when
    # batch permits so the v7x 2-TC 'parallel' axis has work for both cores.
    B_pad = _round_up(B, 8)
    tb = min(B_pad, 256)
    if B_pad >= 16 and B_pad % 16 == 0:
        tb = min(tb, B_pad // 2)
    B_pad = _round_up(B_pad, tb)
    nb = B_pad // tb

    # Time chunking: amortize per-grid-step overhead over Tt timesteps,
    # bounded by a VMEM budget (double-buffered emb chunk + xproj scratch) and
    # chosen as a divisor of T so no padded timesteps touch the recurrence.
    bytes_per_t = (2 * E_pad + H_pad) * tb * 4
    tt_cap = max(1, min(32, (12 * 1024 * 1024) // bytes_per_t))
    Tt = _largest_divisor_leq(T, tt_cap)
    n_chunks = T // Tt

    # Embedding gather (XLA glue): ids laid out (batch_tile, time, row) so the
    # kernel's (Tt*tb, E) chunk is a contiguous, lane-dense row block.
    emb_tbl = _pad_to(params["emb"].astype(f32),
                      (params["emb"].shape[0], E_pad))
    ids = jnp.pad(x_ids, ((0, B_pad - B), (0, 0)))              # (B_pad, T)
    ids_arr = ids.reshape(nb, tb, T).transpose(0, 2, 1)         # (nb, T, tb)
    emb_flat = jnp.take(emb_tbl, ids_arr.reshape(-1), axis=0)   # (nb*T*tb, E_pad)
    emb_last = jnp.take(emb_tbl, ids_arr[:, T - 1, :].reshape(-1),
                        axis=0)                                  # (B_pad, E_pad)

    # Zero-padded weights (pads contribute exact zeros to valid outputs).
    w_ih_f = _pad_to(params["w_ih_f"], (E_pad, H_pad))
    w_hh_f = _pad_to(params["w_hh_f"], (H_pad, H_pad))
    b_f = _pad_to(params["b_f"], (1, H_pad))
    w_ih_b = _pad_to(params["w_ih_b"], (E_pad, H_pad))
    b_b = _pad_to(params["b_b"], (1, H_pad))
    w_out_f = _pad_to(params["w_out_f"], (H_pad, O_pad))
    w_out_b = _pad_to(params["w_out_b"], (H_pad, O_pad))
    b_out = _pad_to(params["b_out"], (1, O_pad))

    const1 = pl.Buffered(1)   # single-buffer never-changing weight blocks

    # ---------- Fused input-projection + forward recurrence ----------------
    h_fwd = pl.pallas_call(
        birnn_fwd_kernel,
        out_shape=jax.ShapeDtypeStruct((B_pad, H_pad), f32),
        grid_spec=pltpu.PrefetchScalarGridSpec(
            num_scalar_prefetch=0,
            grid=(nb, n_chunks),
            in_specs=[
                pl.BlockSpec((Tt * tb, E_pad),
                             lambda b, c: (b * n_chunks + c, 0)),
                pl.BlockSpec((E_pad, H_pad), lambda b, c: (0, 0),
                             pipeline_mode=const1),
                pl.BlockSpec((1, H_pad), lambda b, c: (0, 0),
                             pipeline_mode=const1),
                pl.BlockSpec((H_pad, H_pad), lambda b, c: (0, 0),
                             pipeline_mode=const1),
            ],
            out_specs=pl.BlockSpec((tb, H_pad), lambda b, c: (b, 0)),
            scratch_shapes=[pltpu.VMEM((Tt * tb, H_pad), f32)]),
        compiler_params=pltpu.CompilerParams(
            dimension_semantics=("parallel", "arbitrary")),
        cost_estimate=pl.CostEstimate(
            flops=2 * T * B_pad * H_pad * (E_pad + H_pad),
            transcendentals=T * B_pad * H_pad,
            bytes_accessed=4 * (T * B_pad * E_pad + E_pad * H_pad
                                + H_pad * H_pad + H_pad + B_pad * H_pad)),
    )(emb_flat, w_ih_f, b_f, w_hh_f)

    # ---------- Finalize: backward first step + output linear --------------
    out_pad = pl.pallas_call(
        head_kernel,
        out_shape=jax.ShapeDtypeStruct((B_pad, O_pad), f32),
        grid_spec=pltpu.PrefetchScalarGridSpec(
            num_scalar_prefetch=0,
            grid=(nb,),
            in_specs=[
                pl.BlockSpec((tb, H_pad), lambda b: (b, 0)),
                pl.BlockSpec((tb, E_pad), lambda b: (b, 0)),
                pl.BlockSpec((E_pad, H_pad), lambda b: (0, 0),
                             pipeline_mode=const1),
                pl.BlockSpec((1, H_pad), lambda b: (0, 0),
                             pipeline_mode=const1),
                pl.BlockSpec((H_pad, O_pad), lambda b: (0, 0),
                             pipeline_mode=const1),
                pl.BlockSpec((H_pad, O_pad), lambda b: (0, 0),
                             pipeline_mode=const1),
                pl.BlockSpec((1, O_pad), lambda b: (0, 0),
                             pipeline_mode=const1),
            ],
            out_specs=pl.BlockSpec((tb, O_pad), lambda b: (b, 0))),
        compiler_params=pltpu.CompilerParams(
            dimension_semantics=("parallel",)),
        cost_estimate=pl.CostEstimate(
            flops=2 * B_pad * (E_pad * H_pad + 2 * H_pad * O_pad),
            transcendentals=B_pad * H_pad,
            bytes_accessed=4 * (B_pad * (H_pad + E_pad + O_pad)
                                + E_pad * H_pad + 2 * H_pad * O_pad)),
    )(h_fwd, emb_last, w_ih_b, b_b, w_out_f, w_out_b, b_out)

    return out_pad[:B, :O]


# ---------------------------------------------------------------------------
# Params + reference
# ---------------------------------------------------------------------------
def init_params(key, num_embeddings, embedding_dim, hidden_size, output_size):
    E, H, O = embedding_dim, hidden_size, output_size
    ks = jax.random.split(key, 12)
    kr = 1.0 / float(jnp.sqrt(H))        # nn.RNN init range
    kl = 1.0 / float(jnp.sqrt(2 * H))    # nn.Linear init range (fan_in = 2H)

    def u(k, shape, b):
        return jax.random.uniform(k, shape, jnp.float32, -b, b)

    return dict(
        # stands in for the pretrained word2vec table (synthetic, deterministic)
        emb=jax.random.normal(ks[0], (num_embeddings, E), jnp.float32),
        # forward direction (transposed to (in, out)); biases folded (b_ih + b_hh)
        w_ih_f=u(ks[1], (E, H), kr),
        w_hh_f=u(ks[2], (H, H), kr),
        b_f=u(ks[3], (1, H), kr) + u(ks[4], (1, H), kr),
        # backward direction (only its first step affects out[:, -1, :])
        w_ih_b=u(ks[5], (E, H), kr),
        b_b=u(ks[6], (1, H), kr) + u(ks[7], (1, H), kr),
        # output linear, split into the forward/backward halves of the concat
        w_out_f=u(ks[8], (H, O), kl),
        w_out_b=u(ks[9], (H, O), kl),
        b_out=u(ks[10], (1, O), kl),
    )


def reference(x_ids, p):
    """Pure-JAX reference of the same forward pass for validation."""
    emb = p["emb"][x_ids]  # (B, T, E)
    B, T, _ = emb.shape
    H = p["w_hh_f"].shape[0]
    h = jnp.zeros((B, H), jnp.float32)
    for t in range(T):
        h = jnp.tanh(emb[:, t, :] @ p["w_ih_f"] + h @ p["w_hh_f"] + p["b_f"])
    hb = jnp.tanh(emb[:, T - 1, :] @ p["w_ih_b"] + p["b_b"])
    return h @ p["w_out_f"] + hb @ p["w_out_b"] + p["b_out"]


if __name__ == "__main__":
    # Small, forward-consistent shapes.
    num_embeddings = 100   # vocab size of the (synthetic) embedding table
    embedding_dim = 32     # E
    hidden_size = 32       # H
    output_size = 4        # O
    batch = 2              # B
    seq = 8                # T

    key = jax.random.PRNGKey(0)
    k_param, k_ids = jax.random.split(key)
    params = init_params(k_param, num_embeddings, embedding_dim,
                         hidden_size, output_size)
    x_ids = jax.random.randint(k_ids, (batch, seq), 0, num_embeddings,
                               dtype=jnp.int32)

    logits = jax.block_until_ready(rnn_forward(x_ids, params))
    ref = jax.block_until_ready(reference(x_ids, params))

    assert logits.shape == (batch, output_size)
    assert jnp.allclose(logits, ref, atol=1e-4, rtol=1e-4)
    print("KERNEL_OK")
</pallas_src>

<mosaic_0001>
module attributes {stable_mosaic.version = 11 : i64} {
  func.func @birnn_fwd_kernel(%arg0: i32, %arg1: i32, %arg2: memref<64x128xf32, #tpu.memory_space<vmem>>, %arg3: memref<128x128xf32, #tpu.memory_space<vmem>>, %arg4: memref<1x128xf32, #tpu.memory_space<vmem>>, %arg5: memref<128x128xf32, #tpu.memory_space<vmem>>, %arg6: memref<8x128xf32, #tpu.memory_space<vmem>>, %arg7: memref<64x128xf32, #tpu.memory_space<vmem>>) attributes {dimension_semantics = [#tpu.dimension_semantics<parallel>, #tpu.dimension_semantics<arbitrary>], iteration_bounds = array<i64: 1, 1>, scalar_prefetch = 0 : i64, scratch_operands = 1 : i64, tpu.core_type = #tpu.core_type<tc>, window_params = [{transform_indices = @transform_0, window_bounds = array<i64: 64, 128>}, {pipeline_mode = #tpu.pipeline_mode<synchronous>, transform_indices = @transform_1, window_bounds = array<i64: 128, 128>}, {pipeline_mode = #tpu.pipeline_mode<synchronous>, transform_indices = @transform_2, window_bounds = array<i64: 1, 128>}, {pipeline_mode = #tpu.pipeline_mode<synchronous>, transform_indices = @transform_3, window_bounds = array<i64: 128, 128>}, {transform_indices = @transform_4, window_bounds = array<i64: 8, 128>}]} {
    %c0_i32 = arith.constant 0 : i32
    %0 = arith.cmpi eq, %arg1, %c0_i32 : i32
    %1 = arith.extui %0 : i1 to i32
    %c0_i32_0 = arith.constant 0 : i32
    %2 = arith.cmpi ne, %1, %c0_i32_0 : i32
    scf.if %2 {
      %cst_39 = arith.constant 0.000000e+00 : f32
      %61 = vector.broadcast %cst_39 : f32 to vector<8x128xf32>
      %c0_40 = arith.constant 0 : index
      %c0_41 = arith.constant 0 : index
      %62 = vector.load %arg6[%c0_40, %c0_41] : memref<8x128xf32, #tpu.memory_space<vmem>>, vector<8x128xf32>
      tpu.vector_store %arg6[%c0_40, %c0_41], %61 {strides = array<i32>} : memref<8x128xf32, #tpu.memory_space<vmem>>, vector<8x128xf32>,
    } else {
    }
    %c0 = arith.constant 0 : index
    %c0_1 = arith.constant 0 : index
    %3 = vector.load %arg2[%c0, %c0_1] : memref<64x128xf32, #tpu.memory_space<vmem>>, vector<64x128xf32>
    %c0_2 = arith.constant 0 : index
    %c0_3 = arith.constant 0 : index
    %4 = vector.load %arg3[%c0_2, %c0_3] : memref<128x128xf32, #tpu.memory_space<vmem>>, vector<128x128xf32>
    %cst = arith.constant dense<0.000000e+00> : vector<64x128xf32>
    %5 = tpu.matmul %3, %4, %cst {dimension_numbers = #tpu.dot_dimension_numbers<[1], [0], [0], [1], [0, 0, 1, 1], [], []>} : vector<64x128xf32>, vector<128x128xf32>, vector<64x128xf32> -> vector<64x128xf32>
    %c0_4 = arith.constant 0 : index
    %c0_5 = arith.constant 0 : index
    %6 = vector.load %arg4[%c0_4, %c0_5] : memref<1x128xf32, #tpu.memory_space<vmem>>, vector<1x128xf32>
    %7 = vector.broadcast %6 : vector<1x128xf32> to vector<64x128xf32>
    %8 = arith.addf %5, %7 : vector<64x128xf32>
    %c0_6 = arith.constant 0 : index
    %c0_7 = arith.constant 0 : index
    %9 = vector.load %arg7[%c0_6, %c0_7] : memref<64x128xf32, #tpu.memory_space<vmem>>, vector<64x128xf32>
    tpu.vector_store %arg7[%c0_6, %c0_7], %8 {strides = array<i32>} : memref<64x128xf32, #tpu.memory_space<vmem>>, vector<64x128xf32>,
    %c0_8 = arith.constant 0 : index
    %c0_9 = arith.constant 0 : index
    %10 = vector.load %arg5[%c0_8, %c0_9] : memref<128x128xf32, #tpu.memory_space<vmem>>, vector<128x128xf32>
    %c0_10 = arith.constant 0 : index
    %c0_11 = arith.constant 0 : index
    %11 = vector.load %arg6[%c0_10, %c0_11] : memref<8x128xf32, #tpu.memory_space<vmem>>, vector<8x128xf32>
    %c0_i32_12 = arith.constant 0 : i32
    %c8_i32 = arith.constant 8 : i32
    %12 = arith.muli %c0_i32_12, %c8_i32 : i32
    %13 = arith.index_cast %12 : i32 to index
    %c0_13 = arith.constant 0 : index
    %14 = vector.load %arg7[%13, %c0_13] : memref<64x128xf32, #tpu.memory_space<vmem>>, vector<8x128xf32>
    %cst_14 = arith.constant dense<0.000000e+00> : vector<8x128xf32>
    %15 = tpu.matmul %11, %10, %cst_14 {dimension_numbers = #tpu.dot_dimension_numbers<[1], [0], [0], [1], [0, 0, 1, 1], [], []>} : vector<8x128xf32>, vector<128x128xf32>, vector<8x128xf32> -> vector<8x128xf32>
    %16 = arith.addf %15, %14 : vector<8x128xf32>
    %17 = math.tanh %16 : vector<8x128xf32>
    %c1_i32 = arith.constant 1 : i32
    %c8_i32_15 = arith.constant 8 : i32
    %18 = arith.muli %c1_i32, %c8_i32_15 : i32
    %19 = arith.index_cast %18 : i32 to index
    %c0_16 = arith.constant 0 : index
    %20 = vector.load %arg7[%19, %c0_16] : memref<64x128xf32, #tpu.memory_space<vmem>>, vector<8x128xf32>
    %cst_17 = arith.constant dense<0.000000e+00> : vector<8x128xf32>
    %21 = tpu.matmul %17, %10, %cst_17 {dimension_numbers = #tpu.dot_dimension_numbers<[1], [0], [0], [1], [0, 0, 1, 1], [], []>} : vector<8x128xf32>, vector<128x128xf32>, vector<8x128xf32> -> vector<8x128xf32>
    %22 = arith.addf %21, %20 : vector<8x128xf32>
    %23 = math.tanh %22 : vector<8x128xf32>
    %c2_i32 = arith.constant 2 : i32
    %c8_i32_18 = arith.constant 8 : i32
    %24 = arith.muli %c2_i32, %c8_i32_18 : i32
    %25 = arith.index_cast %24 : i32 to index
    %c0_19 = arith.constant 0 : index
    %26 = vector.load %arg7[%25, %c0_19] : memref<64x128xf32, #tpu.memory_space<vmem>>, vector<8x128xf32>
    %cst_20 = arith.constant dense<0.000000e+00> : vector<8x128xf32>
    %27 = tpu.matmul %23, %10, %cst_20 {dimension_numbers = #tpu.dot_dimension_numbers<[1], [0], [0], [1], [0, 0, 1, 1], [], []>} : vector<8x128xf32>, vector<128x128xf32>, vector<8x128xf32> -> vector<8x128xf32>
    %28 = arith.addf %27, %26 : vector<8x128xf32>
    %29 = math.tanh %28 : vector<8x128xf32>
    %c3_i32 = arith.constant 3 : i32
    %c8_i32_21 = arith.constant 8 : i32
    %30 = arith.muli %c3_i32, %c8_i32_21 : i32
    %31 = arith.index_cast %30 : i32 to index
    %c0_22 = arith.constant 0 : index
    %32 = vector.load %arg7[%31, %c0_22] : memref<64x128xf32, #tpu.memory_space<vmem>>, vector<8x128xf32>
    %cst_23 = arith.constant dense<0.000000e+00> : vector<8x128xf32>
    %33 = tpu.matmul %29, %10, %cst_23 {dimension_numbers = #tpu.dot_dimension_numbers<[1], [0], [0], [1], [0, 0, 1, 1], [], []>} : vector<8x128xf32>, vector<128x128xf32>, vector<8x128xf32> -> vector<8x128xf32>
    %34 = arith.addf %33, %32 : vector<8x128xf32>
    %35 = math.tanh %34 : vector<8x128xf32>
    %c4_i32 = arith.constant 4 : i32
    %c8_i32_24 = arith.constant 8 : i32
    %36 = arith.muli %c4_i32, %c8_i32_24 : i32
    %37 = arith.index_cast %36 : i32 to index
    %c0_25 = arith.constant 0 : index
    %38 = vector.load %arg7[%37, %c0_25] : memref<64x128xf32, #tpu.memory_space<vmem>>, vector<8x128xf32>
    %cst_26 = arith.constant dense<0.000000e+00> : vector<8x128xf32>
    %39 = tpu.matmul %35, %10, %cst_26 {dimension_numbers = #tpu.dot_dimension_numbers<[1], [0], [0], [1], [0, 0, 1, 1], [], []>} : vector<8x128xf32>, vector<128x128xf32>, vector<8x128xf32> -> vector<8x128xf32>
    %40 = arith.addf %39, %38 : vector<8x128xf32>
    %41 = math.tanh %40 : vector<8x128xf32>
    %c5_i32 = arith.constant 5 : i32
    %c8_i32_27 = arith.constant 8 : i32
    %42 = arith.muli %c5_i32, %c8_i32_27 : i32
    %43 = arith.index_cast %42 : i32 to index
    %c0_28 = arith.constant 0 : index
    %44 = vector.load %arg7[%43, %c0_28] : memref<64x128xf32, #tpu.memory_space<vmem>>, vector<8x128xf32>
    %cst_29 = arith.constant dense<0.000000e+00> : vector<8x128xf32>
    %45 = tpu.matmul %41, %10, %cst_29 {dimension_numbers = #tpu.dot_dimension_numbers<[1], [0], [0], [1], [0, 0, 1, 1], [], []>} : vector<8x128xf32>, vector<128x128xf32>, vector<8x128xf32> -> vector<8x128xf32>
    %46 = arith.addf %45, %44 : vector<8x128xf32>
    %47 = math.tanh %46 : vector<8x128xf32>
    %c6_i32 = arith.constant 6 : i32
    %c8_i32_30 = arith.constant 8 : i32
    %48 = arith.muli %c6_i32, %c8_i32_30 : i32
    %49 = arith.index_cast %48 : i32 to index
    %c0_31 = arith.constant 0 : index
    %50 = vector.load %arg7[%49, %c0_31] : memref<64x128xf32, #tpu.memory_space<vmem>>, vector<8x128xf32>
    %cst_32 = arith.constant dense<0.000000e+00> : vector<8x128xf32>
    %51 = tpu.matmul %47, %10, %cst_32 {dimension_numbers = #tpu.dot_dimension_numbers<[1], [0], [0], [1], [0, 0, 1, 1], [], []>} : vector<8x128xf32>, vector<128x128xf32>, vector<8x128xf32> -> vector<8x128xf32>
    %52 = arith.addf %51, %50 : vector<8x128xf32>
    %53 = math.tanh %52 : vector<8x128xf32>
    %c7_i32 = arith.constant 7 : i32
    %c8_i32_33 = arith.constant 8 : i32
    %54 = arith.muli %c7_i32, %c8_i32_33 : i32
    %55 = arith.index_cast %54 : i32 to index
    %c0_34 = arith.constant 0 : index
    %56 = vector.load %arg7[%55, %c0_34] : memref<64x128xf32, #tpu.memory_space<vmem>>, vector<8x128xf32>
    %cst_35 = arith.constant dense<0.000000e+00> : vector<8x128xf32>
    %57 = tpu.matmul %53, %10, %cst_35 {dimension_numbers = #tpu.dot_dimension_numbers<[1], [0], [0], [1], [0, 0, 1, 1], [], []>} : vector<8x128xf32>, vector<128x128xf32>, vector<8x128xf32> -> vector<8x128xf32>
    %58 = arith.addf %57, %56 : vector<8x128xf32>
    %59 = math.tanh %58 : vector<8x128xf32>
    %c8_i32_36 = arith.constant 8 : i32
    %c0_37 = arith.constant 0 : index
    %c0_38 = arith.constant 0 : index
    %60 = vector.load %arg6[%c0_37, %c0_38] : memref<8x128xf32, #tpu.memory_space<vmem>>, vector<8x128xf32>
    tpu.vector_store %arg6[%c0_37, %c0_38], %59 {strides = array<i32>} : memref<8x128xf32, #tpu.memory_space<vmem>>, vector<8x128xf32>,
    return
  }
  func.func @transform_0(%arg0: i32, %arg1: i32) -> (i32, i32) {
    %c1_i32 = arith.constant 1 : i32
    %0 = arith.muli %arg0, %c1_i32 : i32
    %1 = arith.addi %0, %arg1 : i32
    %c0_i32 = arith.constant 0 : i32
    %c0_i32_0 = arith.constant 0 : i32
    return %1, %c0_i32 : i32, i32
  }
  func.func @transform_1(%arg0: i32, %arg1: i32) -> (i32, i32) {
    %c0_i32 = arith.constant 0 : i32
    %c0_i32_0 = arith.constant 0 : i32
    %c0_i32_1 = arith.constant 0 : i32
    return %c0_i32, %c0_i32_0 : i32, i32
  }
  func.func @transform_2(%arg0: i32, %arg1: i32) -> (i32, i32) {
    %c0_i32 = arith.constant 0 : i32
    %c0_i32_0 = arith.constant 0 : i32
    %c0_i32_1 = arith.constant 0 : i32
    return %c0_i32, %c0_i32_0 : i32, i32
  }
  func.func @transform_3(%arg0: i32, %arg1: i32) -> (i32, i32) {
    %c0_i32 = arith.constant 0 : i32
    %c0_i32_0 = arith.constant 0 : i32
    %c0_i32_1 = arith.constant 0 : i32
    return %c0_i32, %c0_i32_0 : i32, i32
  }
  func.func @transform_4(%arg0: i32, %arg1: i32) -> (i32, i32) {
    %c0_i32 = arith.constant 0 : i32
    %c0_i32_0 = arith.constant 0 : i32
    return %arg0, %c0_i32 : i32, i32
  }
}

module attributes {stable_mosaic.version = 11 : i64} {
  func.func @head_kernel(%arg0: i32, %arg1: memref<8x128xf32, #tpu.memory_space<vmem>>, %arg2: memref<8x128xf32, #tpu.memory_space<vmem>>, %arg3: memref<128x128xf32, #tpu.memory_space<vmem>>, %arg4: memref<1x128xf32, #tpu.memory_space<vmem>>, %arg5: memref<128x128xf32, #tpu.memory_space<vmem>>, %arg6: memref<128x128xf32, #tpu.memory_space<vmem>>, %arg7: memref<1x128xf32, #tpu.memory_space<vmem>>, %arg8: memref<8x128xf32, #tpu.memory_space<vmem>>) attributes {dimension_semantics = [#tpu.dimension_semantics<parallel>], iteration_bounds = array<i64: 1>, scalar_prefetch = 0 : i64, scratch_operands = 0 : i64, tpu.core_type = #tpu.core_type<tc>, window_params = [{transform_indices = @transform_0, window_bounds = array<i64: 8, 128>}, {transform_indices = @transform_1, window_bounds = array<i64: 8, 128>}, {pipeline_mode = #tpu.pipeline_mode<synchronous>, transform_indices = @transform_2, window_bounds = array<i64: 128, 128>}, {pipeline_mode = #tpu.pipeline_mode<synchronous>, transform_indices = @transform_3, window_bounds = array<i64: 1, 128>}, {pipeline_mode = #tpu.pipeline_mode<synchronous>, transform_indices = @transform_4, window_bounds = array<i64: 128, 128>}, {pipeline_mode = #tpu.pipeline_mode<synchronous>, transform_indices = @transform_5, window_bounds = array<i64: 128, 128>}, {pipeline_mode = #tpu.pipeline_mode<synchronous>, transform_indices = @transform_6, window_bounds = array<i64: 1, 128>}, {transform_indices = @transform_7, window_bounds = array<i64: 8, 128>}]} {
    %c0 = arith.constant 0 : index
    %c0_0 = arith.constant 0 : index
    %0 = vector.load %arg2[%c0, %c0_0] : memref<8x128xf32, #tpu.memory_space<vmem>>, vector<8x128xf32>
    %c0_1 = arith.constant 0 : index
    %c0_2 = arith.constant 0 : index
    %1 = vector.load %arg3[%c0_1, %c0_2] : memref<128x128xf32, #tpu.memory_space<vmem>>, vector<128x128xf32>
    %cst = arith.constant dense<0.000000e+00> : vector<8x128xf32>
    %2 = tpu.matmul %0, %1, %cst {dimension_numbers = #tpu.dot_dimension_numbers<[1], [0], [0], [1], [0, 0, 1, 1], [], []>} : vector<8x128xf32>, vector<128x128xf32>, vector<8x128xf32> -> vector<8x128xf32>
    %c0_3 = arith.constant 0 : index
    %c0_4 = arith.constant 0 : index
    %3 = vector.load %arg4[%c0_3, %c0_4] : memref<1x128xf32, #tpu.memory_space<vmem>>, vector<1x128xf32>
    %4 = vector.broadcast %3 : vector<1x128xf32> to vector<8x128xf32>
    %5 = arith.addf %2, %4 : vector<8x128xf32>
    %6 = math.tanh %5 : vector<8x128xf32>
    %c0_5 = arith.constant 0 : index
    %c0_6 = arith.constant 0 : index
    %7 = vector.load %arg1[%c0_5, %c0_6] : memref<8x128xf32, #tpu.memory_space<vmem>>, vector<8x128xf32>
    %c0_7 = arith.constant 0 : index
    %c0_8 = arith.constant 0 : index
    %8 = vector.load %arg5[%c0_7, %c0_8] : memref<128x128xf32, #tpu.memory_space<vmem>>, vector<128x128xf32>
    %cst_9 = arith.constant dense<0.000000e+00> : vector<8x128xf32>
    %9 = tpu.matmul %7, %8, %cst_9 {dimension_numbers = #tpu.dot_dimension_numbers<[1], [0], [0], [1], [0, 0, 1, 1], [], []>} : vector<8x128xf32>, vector<128x128xf32>, vector<8x128xf32> -> vector<8x128xf32>
    %c0_10 = arith.constant 0 : index
    %c0_11 = arith.constant 0 : index
    %10 = vector.load %arg6[%c0_10, %c0_11] : memref<128x128xf32, #tpu.memory_space<vmem>>, vector<128x128xf32>
    %cst_12 = arith.constant dense<0.000000e+00> : vector<8x128xf32>
    %11 = tpu.matmul %6, %10, %cst_12 {dimension_numbers = #tpu.dot_dimension_numbers<[1], [0], [0], [1], [0, 0, 1, 1], [], []>} : vector<8x128xf32>, vector<128x128xf32>, vector<8x128xf32> -> vector<8x128xf32>
    %12 = arith.addf %9, %11 : vector<8x128xf32>
    %c0_13 = arith.constant 0 : index
    %c0_14 = arith.constant 0 : index
    %13 = vector.load %arg7[%c0_13, %c0_14] : memref<1x128xf32, #tpu.memory_space<vmem>>, vector<1x128xf32>
    %14 = vector.broadcast %13 : vector<1x128xf32> to vector<8x128xf32>
    %15 = arith.addf %12, %14 : vector<8x128xf32>
    %c0_15 = arith.constant 0 : index
    %c0_16 = arith.constant 0 : index
    %16 = vector.load %arg8[%c0_15, %c0_16] : memref<8x128xf32, #tpu.memory_space<vmem>>, vector<8x128xf32>
    tpu.vector_store %arg8[%c0_15, %c0_16], %15 {strides = array<i32>} : memref<8x128xf32, #tpu.memory_space<vmem>>, vector<8x128xf32>,
    return
  }
  func.func @transform_0(%arg0: i32) -> (i32, i32) {
    %c0_i32 = arith.constant 0 : i32
    %c0_i32_0 = arith.constant 0 : i32
    return %arg0, %c0_i32 : i32, i32
  }
  func.func @transform_1(%arg0: i32) -> (i32, i32) {
    %c0_i32 = arith.constant 0 : i32
    %c0_i32_0 = arith.constant 0 : i32
    return %arg0, %c0_i32 : i32, i32
  }
  func.func @transform_2(%arg0: i32) -> (i32, i32) {
    %c0_i32 = arith.constant 0 : i32
    %c0_i32_0 = arith.constant 0 : i32
    %c0_i32_1 = arith.constant 0 : i32
    return %c0_i32, %c0_i32_0 : i32, i32
  }
  func.func @transform_3(%arg0: i32) -> (i32, i32) {
    %c0_i32 = arith.constant 0 : i32
    %c0_i32_0 = arith.constant 0 : i32
    %c0_i32_1 = arith.constant 0 : i32
    return %c0_i32, %c0_i32_0 : i32, i32
  }
  func.func @transform_4(%arg0: i32) -> (i32, i32) {
    %c0_i32 = arith.constant 0 : i32
    %c0_i32_0 = arith.constant 0 : i32
    %c0_i32_1 = arith.constant 0 : i32
    return %c0_i32, %c0_i32_0 : i32, i32
  }
  func.func @transform_5(%arg0: i32) -> (i32, i32) {
    %c0_i32 = arith.constant 0 : i32
    %c0_i32_0 = arith.constant 0 : i32
    %c0_i32_1 = arith.constant 0 : i32
    return %c0_i32, %c0_i32_0 : i32, i32
  }
  func.func @transform_6(%arg0: i32) -> (i32, i32) {
    %c0_i32 = arith.constant 0 : i32
    %c0_i32_0 = arith.constant 0 : i32
    %c0_i32_1 = arith.constant 0 : i32
    return %c0_i32, %c0_i32_0 : i32, i32
  }
  func.func @transform_7(%arg0: i32) -> (i32, i32) {
    %c0_i32 = arith.constant 0 : i32
    %c0_i32_0 = arith.constant 0 : i32
    return %arg0, %c0_i32 : i32, i32
  }
}

</mosaic_0001>

<bundles_post_ra>
// kernel: rnn_forward.3
= control target key start
LH: loop header
LB: loop body
LE: loop exit
PB: predicated region body
PF: predicated region fallthrough
CT: control target
= control target key end

     0   :  { %v542_v0 = vmov 0.0|0.0   ;;  %vm543_vm0 = vmmov 0   ;;  %v544_v4 = vmov 0.0   ;;  %s774_s2 = inlined_call_operand.vmem [shape: f32[128,128], index: 2, kind: input, shape index: {}]   ;;  %s775_s5 = inlined_call_operand.vmem [shape: f32[128,128], index: 5, kind: input, shape index: {}]   ;;  %s776_s4 = inlined_call_operand.vmem [shape: f32[128,128], index: 4, kind: input, shape index: {}]   ;;  %s777_s1 = inlined_call_operand.vmem [shape: f32[8,128], index: 1, kind: input, shape index: {}]   ;;  %s778_s0 = inlined_call_operand.vmem [shape: f32[8,128], index: 0, kind: input, shape index: {}]   ;;  %s779_s3 = inlined_call_operand.vmem [shape: f32[1,128], index: 3, kind: input, shape index: {}]   ;;  %s780_s6 = inlined_call_operand.vmem [shape: f32[1,128], index: 6, kind: input, shape index: {}]   ;;  %s781_s7 = inlined_call_operand.vmem [shape: f32[8,128], index: 7, kind: output, shape index: {}]  }
   0x1   :  { %465 = vmatprep.subr.bf16.mxu0 %v542_v0  ;;  %v27_v1 = vld [vmem:[%s774_s2] sm:$0xff]  ;;  %v28_v2 = vld [vmem:[%s774_s2 + $0x8] sm:$0xff]  ;;  %v29_v3 = vld [vmem:[%s774_s2 + $0x10] sm:$0xff]  ;;  %392 = vmatprep.mubr.msk.f32.mxu0 %vm543_vm0, %v544_v4 }
   0x2   :  { %v466_v5 = vpack.c.bf16 %v28_v2, %v27_v1  ;;  %v30_v6 = vld [vmem:[%s774_s2 + $0x18] sm:$0xff]  ;;  %489 = vmatprep.subr.bf16.mxu1 %v542_v0  ;;  %427 = vmatprep.mubr.msk.f32.mxu1 %vm543_vm0, %v544_v4  ;;  %v31_v8 = vld [vmem:[%s774_s2 + $0x20] sm:$0xff]  ;;  %v32_v9 = vld [vmem:[%s774_s2 + $0x28] sm:$0xff] }
   0x3   :  { %v469_v7 = vpack.c.bf16 %v30_v6, %v29_v3  ;;  %v138_v10 = vld [vmem:[%s775_s5] sm:$0xff]  ;;  %v139_v11 = vld [vmem:[%s775_s5 + $0x8] sm:$0xff]  ;;  %v472_v12 = vpack.c.bf16 %v32_v9, %v31_v8  ;;  %v140_v14 = vld [vmem:[%s775_s5 + $0x10] sm:$0xff] }
   0x4   :  { %467 = vmatpush3.bf16.msra.mxu0 %v466_v5  ;;  %v490_v13 = vpack.c.bf16 %v139_v11, %v138_v10  ;;  %v33_v15 = vld [vmem:[%s774_s2 + $0x30] sm:$0xff]  ;;  %v34_v16 = vld [vmem:[%s774_s2 + $0x38] sm:$0xff]  ;;  %v142_v19 = vld [vmem:[%s775_s5 + $0x20] sm:$0xff] }
   0x5   :  { %468 = vmatprep.subr.bf16.mxu0 %v542_v0  ;;  %v141_v17 = vld [vmem:[%s775_s5 + $0x18] sm:$0xff]  ;;  %v143_v20 = vld [vmem:[%s775_s5 + $0x28] sm:$0xff]  ;;  %v475_v21 = vpack.c.bf16 %v34_v16, %v33_v15  ;;  %v35_v22 = vld [vmem:[%s774_s2 + $0x40] sm:$0xff] }
   0x6   :  { %491 = vmatpush3.bf16.msra.mxu1 %v490_v13  ;;  %v493_v18 = vpack.c.bf16 %v141_v17, %v140_v14  ;;  %v36_v23 = vld [vmem:[%s774_s2 + $0x48] sm:$0xff]  ;;  %v496_v24 = vpack.c.bf16 %v143_v20, %v142_v19  ;;  %v144_v25 = vld [vmem:[%s775_s5 + $0x30] sm:$0xff]  ;;  %v145_v26 = vld [vmem:[%s775_s5 + $0x38] sm:$0xff] }
   0x7   :  { %492 = vmatprep.subr.bf16.mxu1 %v542_v0  ;;  %v478_v27 = vpack.c.bf16 %v36_v23, %v35_v22  ;;  %v37_v28 = vld [vmem:[%s774_s2 + $0x50] sm:$0xff]  ;;  %v38_v29 = vld [vmem:[%s774_s2 + $0x58] sm:$0xff]  ;;  %v499_v30 = vpack.c.bf16 %v145_v26, %v144_v25  ;;  %v146_v31 = vld [vmem:[%s775_s5 + $0x40] sm:$0xff] }
   0x8   :  { %470 = vmatpush3.bf16.msra.mxu0 %v469_v7  ;;  %v147_v32 = vld [vmem:[%s775_s5 + $0x48] sm:$0xff]  ;;  %v481_v33 = vpack.c.bf16 %v38_v29, %v37_v28  ;;  %v39_v34 = vld [vmem:[%s774_s2 + $0x60] sm:$0xff]  ;;  %v41_v38 = vld [vmem:[%s774_s2 + $0x70] sm:$0xff] }
   0x9   :  { %471 = vmatprep.subr.bf16.mxu0 %v542_v0  ;;  %v40_v35 = vld [vmem:[%s774_s2 + $0x68] sm:$0xff]  ;;  %v502_v36 = vpack.c.bf16 %v147_v32, %v146_v31  ;;  %v42_v39 = vld [vmem:[%s774_s2 + $0x78] sm:$0xff]  ;;  %v122_v41 = vld [vmem:[%s776_s4] sm:$0xff] }
   0xa   :  { %494 = vmatpush3.bf16.msra.mxu1 %v493_v18  ;;  %v484_v37 = vpack.c.bf16 %v40_v35, %v39_v34  ;;  %v487_v40 = vpack.c.bf16 %v42_v39, %v41_v38  ;;  %v123_v42 = vld [vmem:[%s776_s4 + $0x8] sm:$0xff]  ;;  %v26_v43 = vld [vmem:[%s777_s1] sm:$0xff]  ;;  %v124_v45 = vld [vmem:[%s776_s4 + $0x10] sm:$0xff] }
   0xb   :  { %495 = vmatprep.subr.bf16.mxu1 %v542_v0  ;;  %v514_v44 = vpack.c.bf16 %v123_v42, %v122_v41  ;;  %v125_v46 = vld [vmem:[%s776_s4 + $0x18] sm:$0xff]  ;;  %v126_v48 = vld [vmem:[%s776_s4 + $0x20] sm:$0xff]  ;;  %v127_v49 = vld [vmem:[%s776_s4 + $0x28] sm:$0xff] }
   0xc   :  { %473 = vmatpush3.bf16.msra.mxu0 %v472_v12  ;;  %v517_v47 = vpack.c.bf16 %v125_v46, %v124_v45  ;;  %v520_v50 = vpack.c.bf16 %v127_v49, %v126_v48  ;;  %v128_v51 = vld [vmem:[%s776_s4 + $0x30] sm:$0xff]  ;;  %v129_v52 = vld [vmem:[%s776_s4 + $0x38] sm:$0xff]  ;;  %v130_v54 = vld [vmem:[%s776_s4 + $0x40] sm:$0xff] }
   0xd   :  { %474 = vmatprep.subr.bf16.mxu0 %v542_v0  ;;  %v523_v53 = vpack.c.bf16 %v129_v52, %v128_v51  ;;  %v131_v55 = vld [vmem:[%s776_s4 + $0x48] sm:$0xff]  ;;  %v132_v57 = vld [vmem:[%s776_s4 + $0x50] sm:$0xff]  ;;  %v133_v58 = vld [vmem:[%s776_s4 + $0x58] sm:$0xff] }
   0xe   :  { %497 = vmatpush3.bf16.msra.mxu1 %v496_v24  ;;  %v526_v56 = vpack.c.bf16 %v131_v55, %v130_v54  ;;  %v529_v59 = vpack.c.bf16 %v133_v58, %v132_v57  ;;  %v148_v60 = vld [vmem:[%s775_s5 + $0x50] sm:$0xff]  ;;  %v149_v61 = vld [vmem:[%s775_s5 + $0x58] sm:$0xff]  ;;  %v134_v63 = vld [vmem:[%s776_s4 + $0x60] sm:$0xff] }
   0xf   :  { %498 = vmatprep.subr.bf16.mxu1 %v542_v0  ;;  %v505_v62 = vpack.c.bf16 %v149_v61, %v148_v60  ;;  %v135_v1 = vld [vmem:[%s776_s4 + $0x68] sm:$0xff]  ;;  %v150_v2 = vld [vmem:[%s775_s5 + $0x60] sm:$0xff]  ;;  %v136_v5 = vld [vmem:[%s776_s4 + $0x70] sm:$0xff] }
  0x10   :  { %476 = vmatpush3.bf16.msra.mxu0 %v475_v21  ;;  %v532_v3 = vpack.c.bf16 %v135_v1, %v134_v63  ;;  %v137_v6 = vld [vmem:[%s776_s4 + $0x78] sm:$0xff]  ;;  %v152_v8 = vld [vmem:[%s775_s5 + $0x70] sm:$0xff]  ;;  %v121_v12 = vld [vmem:[%s778_s0] sm:$0xff] }
  0x11   :  { %477 = vmatprep.subr.bf16.mxu0 %v542_v0  ;;  %v153_v9 = vld [vmem:[%s775_s5 + $0x78] sm:$0xff]  ;;  %v535_v10 = vpack.c.bf16 %v137_v6, %v136_v5  ;;  %v307_v13 = vld [vmem:[%s779_s3] ss:$0 sm:$0xff] }
  0x12   :  { %500 = vmatpush3.bf16.msra.mxu1 %v499_v30  ;;  %v511_v11 = vpack.c.bf16 %v153_v9, %v152_v8  ;;  %v308_v20 = vld [vmem:[%s780_s6] ss:$0 sm:$0xff] }
  0x13   :  { %501 = vmatprep.subr.bf16.mxu1 %v542_v0 }
  0x14   :  { %479 = vmatpush3.bf16.msra.mxu0 %v478_v27 }
  0x15   :  { %480 = vmatprep.subr.bf16.mxu0 %v542_v0 }
  0x16   :  { %503 = vmatpush3.bf16.msra.mxu1 %v502_v36 }
  0x17   :  { %504 = vmatprep.subr.bf16.mxu1 %v542_v0 }
  0x18   :  { %482 = vmatpush3.bf16.msra.mxu0 %v481_v33 }
  0x19   :  { %483 = vmatprep.subr.bf16.mxu0 %v542_v0 }
  0x1a   :  { %506 = vmatpush3.bf16.msra.mxu1 %v505_v62 }
  0x1b   :  { %507 = vmatprep.subr.bf16.mxu1 %v542_v0 }
  0x1c   :  { %485 = vmatpush3.bf16.msra.mxu0 %v484_v37 }
  0x1d   :  { %486 = vmatprep.subr.bf16.mxu0 %v542_v0 }
  0x20   :  { %488 = vmatpush3.bf16.msra.mxu0 %v487_v40 }
  0x21   :  { %513 = vmatprep.subr.bf16.mxu0 %v542_v0 }
  0x23   :  { %393 = vmatmul.mubr.f32.vlgmr.msra.gmra.mrb[0].mxu0 %v26_v43 }
  0x24   :  { %515 = vmatpush3.bf16.msra.mxu0 %v514_v44  ;;  %462 = vmatprep.mubr.msk.f32.mxu0 %vm543_vm0, %v544_v4  ;;  %v151_v4 = vld [vmem:[%s775_s5 + $0x68] sm:$0xff] }
  0x25   :  { %516 = vmatprep.subr.bf16.mxu0 %v542_v0  ;;  %v508_v7 = vpack.c.bf16 %v151_v4, %v150_v2 }
  0x27   :  { %509 = vmatpush3.bf16.msra.mxu1 %v508_v7 }
  0x28   :  { %518 = vmatpush3.bf16.msra.mxu0 %v517_v47  ;;  %510 = vmatprep.subr.bf16.mxu1 %v542_v0 }
  0x29   :  { %519 = vmatprep.subr.bf16.mxu0 %v542_v0 }
  0x2b   :  { %512 = vmatpush3.bf16.msra.mxu1 %v511_v11 }
  0x2c   :  { %521 = vmatpush3.bf16.msra.mxu0 %v520_v50 }
  0x2d   :  { %522 = vmatprep.subr.bf16.mxu0 %v542_v0 }
  0x30   :  { %524 = vmatpush3.bf16.msra.mxu0 %v523_v53 }
  0x31   :  { %525 = vmatprep.subr.bf16.mxu0 %v542_v0 }
  0x34   :  { %527 = vmatpush3.bf16.msra.mxu0 %v526_v56 }
  0x35   :  { %528 = vmatprep.subr.bf16.mxu0 %v542_v0 }
  0x38   :  { %530 = vmatpush3.bf16.msra.mxu0 %v529_v59 }
  0x39   :  { %531 = vmatprep.subr.bf16.mxu0 %v542_v0 }
  0x3c   :  { %533 = vmatpush3.bf16.msra.mxu0 %v532_v3 }
  0x3d   :  { %534 = vmatprep.subr.bf16.mxu0 %v542_v0 }
  0x40   :  { %536 = vmatpush3.bf16.msra.mxu0 %v535_v10 }
  0x43   :  { %463 = vmatmul.mubr.f32.vlgmr.msra.gmra.mrb[2].mxu0 %v121_v12 }
  0xf6   :  { %v116_v14 = vpop.f32.mrb[0].mxu0 }
  0xf7   :  { %v117_v15 = vadd.f32 %v307_v13, %v116_v14  ;;  %v394_v16 = vpop.f32.mrb[1].mxu0 }
  0xf9   :  { %540 = vtanh.f32 %v117_v15 }
 0x103   :  { %v541_v17 = vpop.eup %540 }
 0x104   :  { %428 = vmatmul.mubr.f32.vlgmr.msra.gmra.mrb[0].mxu1 %v541_v17 }
 0x116   :  { %v290_v18 = vpop.f32.mrb[2].mxu0 }
 0x117   :  { %v464_v19 = vpop.f32.mrb[3].mxu0 }
 0x1d7   :  { %v220_v0 = vpop.f32.mrb[0].mxu1 }
 0x1d8   :  { %v291_v21 = vadd.f32 %v290_v18, %v220_v0  ;;  %v429_v22 = vpop.f32.mrb[1].mxu1 }
 0x1da   :  { %v301_v23 = vadd.f32 %v308_v20, %v291_v21 }
 0x1dc   :  { %302 = vst [vmem:[%s781_s7] sm:$0xff] %v301_v23 }

// kernel: rnn_forward.2
= control target key start
LH: loop header
LB: loop body
LE: loop exit
PB: predicated region body
PF: predicated region fallthrough
CT: control target
= control target key end

     0   :  { %v1520_v2 = vmov 0.0|0.0   ;;  %vm1521_vm0 = vmmov 0   ;;  %v1522_v4 = vmov 0.0   ;;  %s1857_s1 = inlined_call_operand.vmem [shape: f32[128,128], index: 1, kind: input, shape index: {}]   ;;  %s1858_s3 = inlined_call_operand.vmem [shape: f32[128,128], index: 3, kind: input, shape index: {}]   ;;  %s1859_s0 = inlined_call_operand.vmem [shape: f32[64,128], index: 0, kind: input, shape index: {}]   ;;  %s1860_s2 = inlined_call_operand.vmem [shape: f32[1,128], index: 2, kind: input, shape index: {}]   ;;  %s1861_s4 = inlined_call_operand.vmem [shape: f32[8,128], index: 4, kind: output, shape index: {}]  }
   0x1   :  { %v52_v0 = vld [vmem:[%s1857_s1] sm:$0xff]  ;;  %v53_v1 = vld [vmem:[%s1857_s1 + $0x8] sm:$0xff]  ;;  %1309 = vmatprep.subr.bf16.mxu1 %v1520_v2  ;;  %1029 = vmatprep.mubr.msk.f32.mxu1 %vm1521_vm0, %v1522_v4  ;;  %v54_v7 = vld [vmem:[%s1857_s1 + $0x10] sm:$0xff] }
   0x2   :  { %v188_v3 = vld [vmem:[%s1858_s3] sm:$0xff]  ;;  %v1277_v5 = vpack.c.bf16 %v53_v1, %v52_v0  ;;  %v189_v6 = vld [vmem:[%s1858_s3 + $0x8] sm:$0xff]  ;;  %v55_v8 = vld [vmem:[%s1857_s1 + $0x18] sm:$0xff] }
   0x3   :  { %v1569_v9 = vpack.c.bf16 %v189_v6, %v188_v3  ;;  %v1281_v10 = vpack.c.bf16 %v55_v8, %v54_v7  ;;  %v190_v11 = vld [vmem:[%s1858_s3 + $0x10] sm:$0xff]  ;;  %v191_v12 = vld [vmem:[%s1858_s3 + $0x18] sm:$0xff]  ;;  %v56_v13 = vld [vmem:[%s1857_s1 + $0x20] sm:$0xff] }
   0x4   :  { %1278 = vmatprep.subr.bf16.mxu0 %v1277_v5  ;;  %v57_v14 = vld [vmem:[%s1857_s1 + $0x28] sm:$0xff]  ;;  %v1584_v15 = vpack.c.bf16 %v191_v12, %v190_v11  ;;  %v192_v17 = vld [vmem:[%s1858_s3 + $0x20] sm:$0xff]  ;;  %v58_v19 = vld [vmem:[%s1857_s1 + $0x30] sm:$0xff] }
   0x5   :  { %1280 = vmatpush3.bf16.msra.mxu0 %v1277_v5  ;;  %1311 = vmatpush3.bf16.msra.mxu1 %v1569_v9  ;;  %v1285_v16 = vpack.c.bf16 %v57_v14, %v56_v13  ;;  %v193_v18 = vld [vmem:[%s1858_s3 + $0x28] sm:$0xff]  ;;  %v59_v20 = vld [vmem:[%s1857_s1 + $0x38] sm:$0xff]  ;;  %v194_v23 = vld [vmem:[%s1858_s3 + $0x30] sm:$0xff] }
   0x6   :  { %1282 = vmatprep.subr.bf16.mxu0 %v1281_v10  ;;  %1312 = vmatprep.subr.bf16.mxu1 %v1520_v2  ;;  %v1600_v21 = vpack.c.bf16 %v193_v18, %v192_v17  ;;  %v1289_v22 = vpack.c.bf16 %v59_v20, %v58_v19  ;;  %v195_v24 = vld [vmem:[%s1858_s3 + $0x38] sm:$0xff]  ;;  %v60_v25 = vld [vmem:[%s1857_s1 + $0x40] sm:$0xff]  ;;  %v61_v26 = vld [vmem:[%s1857_s1 + $0x48] sm:$0xff] }
   0x7   :  { %v44_v27 = vld [vmem:[%s1859_s0] sm:$0xff]  ;;  %v1619_v28 = vpack.c.bf16 %v195_v24, %v194_v23  ;;  %v1293_v29 = vpack.c.bf16 %v61_v26, %v60_v25  ;;  %v197_v31 = vld [vmem:[%s1858_s3 + $0x48] sm:$0xff]  ;;  %v62_v32 = vld [vmem:[%s1857_s1 + $0x50] sm:$0xff] }
   0x8   :  { %985 = vmatprep.mubr.f32.mxu0 %v44_v27  ;;  %v196_v30 = vld [vmem:[%s1858_s3 + $0x40] sm:$0xff]  ;;  %v63_v33 = vld [vmem:[%s1857_s1 + $0x58] sm:$0xff]  ;;  %v198_v36 = vld [vmem:[%s1858_s3 + $0x50] sm:$0xff] }
   0x9   :  { %1284 = vmatpush3.bf16.msra.mxu0 %v1281_v10  ;;  %1314 = vmatpush3.bf16.msra.mxu1 %v1584_v15  ;;  %v1635_v34 = vpack.c.bf16 %v197_v31, %v196_v30  ;;  %v1297_v35 = vpack.c.bf16 %v63_v33, %v62_v32  ;;  %v199_v37 = vld [vmem:[%s1858_s3 + $0x58] sm:$0xff]  ;;  %v64_v38 = vld [vmem:[%s1857_s1 + $0x60] sm:$0xff]  ;;  %v65_v39 = vld [vmem:[%s1857_s1 + $0x68] sm:$0xff] }
   0xa   :  { %1286 = vmatprep.subr.bf16.mxu0 %v1285_v16  ;;  %1315 = vmatprep.subr.bf16.mxu1 %v1520_v2  ;;  %v1651_v40 = vpack.c.bf16 %v199_v37, %v198_v36  ;;  %v1301_v41 = vpack.c.bf16 %v65_v39, %v64_v38  ;;  %v200_v42 = vld [vmem:[%s1858_s3 + $0x60] sm:$0xff]  ;;  %v201_v43 = vld [vmem:[%s1858_s3 + $0x68] sm:$0xff]  ;;  %v66_v44 = vld [vmem:[%s1857_s1 + $0x70] sm:$0xff] }
   0xb   :  { %v67_v45 = vld [vmem:[%s1857_s1 + $0x78] sm:$0xff]  ;;  %v1667_v46 = vpack.c.bf16 %v201_v43, %v200_v42  ;;  %v202_v48 = vld [vmem:[%s1858_s3 + $0x70] sm:$0xff]  ;;  %v45_v51 = vld [vmem:[%s1859_s0 + $0x8] sm:$0xff] }
   0xc   :  { %v1305_v47 = vpack.c.bf16 %v67_v45, %v66_v44  ;;  %v203_v49 = vld [vmem:[%s1858_s3 + $0x78] sm:$0xff]  ;;  %v46_v52 = vld [vmem:[%s1859_s0 + $0x10] sm:$0xff]  ;;  %v48_v54 = vld [vmem:[%s1859_s0 + $0x20] sm:$0xff] }
   0xd   :  { %1288 = vmatpush3.bf16.msra.mxu0 %v1285_v16  ;;  %1317 = vmatpush3.bf16.msra.mxu1 %v1600_v21  ;;  %v1677_v50 = vpack.c.bf16 %v203_v49, %v202_v48  ;;  %v47_v53 = vld [vmem:[%s1859_s0 + $0x18] sm:$0xff]  ;;  %v49_v55 = vld [vmem:[%s1859_s0 + $0x28] sm:$0xff]  ;;  %v50_v56 = vld [vmem:[%s1859_s0 + $0x30] sm:$0xff] }
   0xe   :  { %1290 = vmatprep.subr.bf16.mxu0 %v1289_v22  ;;  %1318 = vmatprep.subr.bf16.mxu1 %v1520_v2  ;;  %v51_v57 = vld [vmem:[%s1859_s0 + $0x38] sm:$0xff]  ;;  %v1744_v58 = vld [vmem:[%s1860_s2] ss:$0 sm:$0xff] }
  0x11   :  { %1292 = vmatpush3.bf16.msra.mxu0 %v1289_v22  ;;  %1320 = vmatpush3.bf16.msra.mxu1 %v1619_v28 }
  0x12   :  { %1294 = vmatprep.subr.bf16.mxu0 %v1293_v29  ;;  %1321 = vmatprep.subr.bf16.mxu1 %v1520_v2 }
  0x15   :  { %1296 = vmatpush3.bf16.msra.mxu0 %v1293_v29  ;;  %1323 = vmatpush3.bf16.msra.mxu1 %v1635_v34 }
  0x16   :  { %1298 = vmatprep.subr.bf16.mxu0 %v1297_v35  ;;  %1324 = vmatprep.subr.bf16.mxu1 %v1520_v2 }
  0x19   :  { %1300 = vmatpush3.bf16.msra.mxu0 %v1297_v35  ;;  %1326 = vmatpush3.bf16.msra.mxu1 %v1651_v40 }
  0x1a   :  { %1302 = vmatprep.subr.bf16.mxu0 %v1301_v41  ;;  %1327 = vmatprep.subr.bf16.mxu1 %v1520_v2 }
  0x1d   :  { %1304 = vmatpush3.bf16.msra.mxu0 %v1301_v41  ;;  %1329 = vmatpush3.bf16.msra.mxu1 %v1667_v46 }
  0x1e   :  { %1306 = vmatprep.subr.bf16.mxu0 %v1305_v47  ;;  %1330 = vmatprep.subr.bf16.mxu1 %v1520_v2 }
  0x21   :  { %1308 = vmatpush3.bf16.msra.mxu0 %v1305_v47  ;;  %1332 = vmatpush3.bf16.msra.mxu1 %v1677_v50 }
  0x22   :  { %1333 = vmatprep.subr.bf16.mxu0 %v1520_v2  ;;  %1357 = vmatprep.subr.bf16.mxu1 %v1520_v2 }
  0x24   :  { %986 = vmatmul.mubr.f32.vlgmr.msra.gmra.mrb[0].mxu0 %v45_v51  ;;  %1030 = vmatmul.mubr.f32.vlgmr.msra.gmra.mrb[0].mxu1 %v1522_v4 }
  0x25   :  { %1335 = vmatpush3.bf16.msra.mxu0 %v1569_v9  ;;  %1359 = vmatpush3.bf16.msra.mxu1 %v1569_v9 }
  0x26   :  { %1336 = vmatprep.subr.bf16.mxu0 %v1520_v2  ;;  %1360 = vmatprep.subr.bf16.mxu1 %v1520_v2 }
  0x27   :  { %1099 = vmatprep.mubr.msk.f32.mxu1 %vm1521_vm0, %v1522_v4  ;;  %988 = vmatprep.mubr.f32.mxu0 %v46_v52 }
  0x28   :  { %989 = vmatmul.mubr.f32.gmra.mrb[2].mxu0 %v47_v53 }
  0x29   :  { %1338 = vmatpush3.bf16.msra.mxu0 %v1584_v15  ;;  %1362 = vmatpush3.bf16.msra.mxu1 %v1584_v15 }
  0x2a   :  { %1339 = vmatprep.subr.bf16.mxu0 %v1520_v2  ;;  %1363 = vmatprep.subr.bf16.mxu1 %v1520_v2 }
  0x2b   :  { %991 = vmatprep.mubr.f32.mxu0 %v48_v54 }
  0x2c   :  { %992 = vmatmul.mubr.f32.gmra.mrb[4].mxu0 %v49_v55 }
  0x2d   :  { %1341 = vmatpush3.bf16.msra.mxu0 %v1600_v21  ;;  %1365 = vmatpush3.bf16.msra.mxu1 %v1600_v21 }
  0x2e   :  { %1342 = vmatprep.subr.bf16.mxu0 %v1520_v2  ;;  %1366 = vmatprep.subr.bf16.mxu1 %v1520_v2 }
  0x2f   :  { %994 = vmatprep.mubr.f32.mxu0 %v50_v56 }
  0x30   :  { %995 = vmatmul.mubr.f32.gmra.mrb[6].mxu0 %v51_v57 }
  0x31   :  { %1344 = vmatpush3.bf16.msra.mxu0 %v1619_v28  ;;  %1368 = vmatpush3.bf16.msra.mxu1 %v1619_v28 }
  0x32   :  { %1345 = vmatprep.subr.bf16.mxu0 %v1520_v2  ;;  %1369 = vmatprep.subr.bf16.mxu1 %v1520_v2 }
  0x33   :  { %1064 = vmatprep.mubr.msk.f32.mxu0 %vm1521_vm0, %v1522_v4 }
  0x35   :  { %1347 = vmatpush3.bf16.msra.mxu0 %v1635_v34  ;;  %1371 = vmatpush3.bf16.msra.mxu1 %v1635_v34 }
  0x36   :  { %1348 = vmatprep.subr.bf16.mxu0 %v1520_v2  ;;  %1372 = vmatprep.subr.bf16.mxu1 %v1520_v2 }
  0x39   :  { %1350 = vmatpush3.bf16.msra.mxu0 %v1651_v40  ;;  %1374 = vmatpush3.bf16.msra.mxu1 %v1651_v40 }
  0x3a   :  { %1351 = vmatprep.subr.bf16.mxu0 %v1520_v2  ;;  %1375 = vmatprep.subr.bf16.mxu1 %v1520_v2 }
  0x3d   :  { %1353 = vmatpush3.bf16.msra.mxu0 %v1667_v46  ;;  %1377 = vmatpush3.bf16.msra.mxu1 %v1667_v46 }
  0x3e   :  { %1354 = vmatprep.subr.bf16.mxu0 %v1520_v2  ;;  %1378 = vmatprep.subr.bf16.mxu1 %v1520_v2 }
  0x41   :  { %1356 = vmatpush3.bf16.msra.mxu0 %v1677_v50  ;;  %1380 = vmatpush3.bf16.msra.mxu1 %v1677_v50 }
  0x42   :  { %1381 = vmatprep.subr.bf16.mxu0 %v1520_v2  ;;  %1405 = vmatprep.subr.bf16.mxu1 %v1520_v2 }
  0xf7   :  { %v987_v59 = vpop.f32.mrb[0].mxu0  ;;  %v272_v60 = vpop.f32.mrb[0].mxu1 }
  0xf8   :  { %v141_v61 = vpop.f32.mrb[1].mxu0  ;;  %v1031_v62 = vpop.f32.mrb[1].mxu1  ;;  %v147_v11 = vadd.f32 %v987_v59, %v1744_v58 }
  0xf9   :  { %v142_v63 = vadd.f32 %v1744_v58, %v141_v61 }
  0xfb   :  { %v273_v0 = vadd.f32 %v272_v60, %v142_v63  ;;  %v990_v3 = vpop.f32.mrb[2].mxu0 }
  0xfc   :  { %v151_v5 = vpop.f32.mrb[3].mxu0  ;;  %v157_v23 = vadd.f32 %v990_v3, %v1744_v58 }
  0xfd   :  { %1504 = vtanh.f32 %v273_v0  ;;  %v152_v17 = vadd.f32 %v1744_v58, %v151_v5 }
  0xff   :  { %v1765_v6 = vpop.f32.mrb[4].mxu0 }
 0x100   :  { %v1767_v7 = vpop.f32.mrb[5].mxu0 }
 0x101   :  { %v162_v29 = vadd.f32 %v1744_v58, %v1767_v7 }
 0x103   :  { %v1769_v8 = vpop.f32.mrb[6].mxu0 }
 0x104   :  { %v1771_v10 = vpop.f32.mrb[7].mxu0 }
 0x107   :  { %v1505_v1 = vpop.eup %1504 }
 0x108   :  { %1065 = vmatmul.mubr.f32.vlgmr.msra.gmra.mrb[8].mxu0 %v1505_v1 }
 0x109   :  { %1383 = vmatpush3.bf16.msra.mxu0 %v1569_v9  ;;  %1134 = vmatprep.mubr.msk.f32.mxu0 %vm1521_vm0, %v1522_v4 }
 0x10a   :  { %1384 = vmatprep.subr.bf16.mxu0 %v1520_v2 }
 0x10d   :  { %1386 = vmatpush3.bf16.msra.mxu0 %v1584_v15 }
 0x10e   :  { %1387 = vmatprep.subr.bf16.mxu0 %v1520_v2 }
 0x111   :  { %1389 = vmatpush3.bf16.msra.mxu0 %v1600_v21 }
 0x112   :  { %1390 = vmatprep.subr.bf16.mxu0 %v1520_v2 }
 0x115   :  { %1392 = vmatpush3.bf16.msra.mxu0 %v1619_v28 }
 0x116   :  { %1393 = vmatprep.subr.bf16.mxu0 %v1520_v2 }
 0x119   :  { %1395 = vmatpush3.bf16.msra.mxu0 %v1635_v34 }
 0x11a   :  { %1396 = vmatprep.subr.bf16.mxu0 %v1520_v2 }
 0x11d   :  { %1398 = vmatpush3.bf16.msra.mxu0 %v1651_v40 }
 0x11e   :  { %1399 = vmatprep.subr.bf16.mxu0 %v1520_v2 }
 0x121   :  { %1401 = vmatpush3.bf16.msra.mxu0 %v1667_v46 }
 0x122   :  { %1402 = vmatprep.subr.bf16.mxu0 %v1520_v2 }
 0x125   :  { %1404 = vmatpush3.bf16.msra.mxu0 %v1677_v50 }
 0x126   :  { %1429 = vmatprep.subr.bf16.mxu0 %v1520_v2 }
 0x1db   :  { %v344_v12 = vpop.f32.mrb[8].mxu0 }
 0x1dc   :  { %v345_v13 = vadd.f32 %v344_v12, %v147_v11  ;;  %v1066_v14 = vpop.f32.mrb[9].mxu0 }
 0x1de   :  { %1506 = vtanh.f32 %v345_v13 }
 0x1e8   :  { %v1507_v16 = vpop.eup %1506 }
 0x1e9   :  { %1100 = vmatmul.mubr.f32.vlgmr.msra.gmra.mrb[2].mxu1 %v1507_v16 }
 0x1ea   :  { %1407 = vmatpush3.bf16.msra.mxu1 %v1569_v9  ;;  %1169 = vmatprep.mubr.msk.f32.mxu1 %vm1521_vm0, %v1522_v4 }
 0x1eb   :  { %1408 = vmatprep.subr.bf16.mxu1 %v1520_v2 }
 0x1ee   :  { %1410 = vmatpush3.bf16.msra.mxu1 %v1584_v15 }
 0x1ef   :  { %1411 = vmatprep.subr.bf16.mxu1 %v1520_v2 }
 0x1f2   :  { %1413 = vmatpush3.bf16.msra.mxu1 %v1600_v21 }
 0x1f3   :  { %1414 = vmatprep.subr.bf16.mxu1 %v1520_v2 }
 0x1f6   :  { %1416 = vmatpush3.bf16.msra.mxu1 %v1619_v28 }
 0x1f7   :  { %1417 = vmatprep.subr.bf16.mxu1 %v1520_v2 }
 0x1fa   :  { %1419 = vmatpush3.bf16.msra.mxu1 %v1635_v34 }
 0x1fb   :  { %1420 = vmatprep.subr.bf16.mxu1 %v1520_v2 }
 0x1fe   :  { %1422 = vmatpush3.bf16.msra.mxu1 %v1651_v40 }
 0x1ff   :  { %1423 = vmatprep.subr.bf16.mxu1 %v1520_v2 }
 0x202   :  { %1425 = vmatpush3.bf16.msra.mxu1 %v1667_v46 }
 0x203   :  { %1426 = vmatprep.subr.bf16.mxu1 %v1520_v2 }
 0x206   :  { %1428 = vmatpush3.bf16.msra.mxu1 %v1677_v50 }
 0x207   :  { %1453 = vmatprep.subr.bf16.mxu1 %v1520_v2 }
 0x2bc   :  { %v416_v18 = vpop.f32.mrb[2].mxu1 }
 0x2bd   :  { %v417_v19 = vadd.f32 %v416_v18, %v152_v17  ;;  %v1101_v20 = vpop.f32.mrb[3].mxu1 }
 0x2bf   :  { %1508 = vtanh.f32 %v417_v19 }
 0x2c9   :  { %v1509_v22 = vpop.eup %1508 }
 0x2ca   :  { %1135 = vmatmul.mubr.f32.vlgmr.msra.gmra.mrb[10].mxu0 %v1509_v22 }
 0x2cb   :  { %1431 = vmatpush3.bf16.msra.mxu0 %v1569_v9  ;;  %1204 = vmatprep.mubr.msk.f32.mxu0 %vm1521_vm0, %v1522_v4 }
 0x2cc   :  { %1432 = vmatprep.subr.bf16.mxu0 %v1520_v2 }
 0x2cf   :  { %1434 = vmatpush3.bf16.msra.mxu0 %v1584_v15 }
 0x2d0   :  { %1435 = vmatprep.subr.bf16.mxu0 %v1520_v2 }
 0x2d3   :  { %1437 = vmatpush3.bf16.msra.mxu0 %v1600_v21 }
 0x2d4   :  { %1438 = vmatprep.subr.bf16.mxu0 %v1520_v2 }
 0x2d7   :  { %1440 = vmatpush3.bf16.msra.mxu0 %v1619_v28 }
 0x2d8   :  { %1441 = vmatprep.subr.bf16.mxu0 %v1520_v2 }
 0x2db   :  { %1443 = vmatpush3.bf16.msra.mxu0 %v1635_v34 }
 0x2dc   :  { %1444 = vmatprep.subr.bf16.mxu0 %v1520_v2 }
 0x2df   :  { %1446 = vmatpush3.bf16.msra.mxu0 %v1651_v40 }
 0x2e0   :  { %1447 = vmatprep.subr.bf16.mxu0 %v1520_v2 }
 0x2e3   :  { %1449 = vmatpush3.bf16.msra.mxu0 %v1667_v46 }
 0x2e4   :  { %1450 = vmatprep.subr.bf16.mxu0 %v1520_v2 }
 0x2e7   :  { %1452 = vmatpush3.bf16.msra.mxu0 %v1677_v50 }
 0x2e8   :  { %1477 = vmatprep.subr.bf16.mxu0 %v1520_v2 }
 0x39d   :  { %v488_v24 = vpop.f32.mrb[10].mxu0 }
 0x39e   :  { %v489_v25 = vadd.f32 %v488_v24, %v157_v23  ;;  %v1136_v26 = vpop.f32.mrb[11].mxu0 }
 0x3a0   :  { %1510 = vtanh.f32 %v489_v25 }
 0x3aa   :  { %v1511_v27 = vpop.eup %1510 }
 0x3ab   :  { %1170 = vmatmul.mubr.f32.vlgmr.msra.gmra.mrb[4].mxu1 %v1511_v27 }
 0x3ac   :  { %1455 = vmatpush3.bf16.msra.mxu1 %v1569_v9  ;;  %1239 = vmatprep.mubr.msk.f32.mxu1 %vm1521_vm0, %v1522_v4 }
 0x3ad   :  { %1456 = vmatprep.subr.bf16.mxu1 %v1520_v2 }
 0x3b0   :  { %1458 = vmatpush3.bf16.msra.mxu1 %v1584_v15 }
 0x3b1   :  { %1459 = vmatprep.subr.bf16.mxu1 %v1520_v2 }
 0x3b4   :  { %1461 = vmatpush3.bf16.msra.mxu1 %v1600_v21 }
 0x3b5   :  { %1462 = vmatprep.subr.bf16.mxu1 %v1520_v2 }
 0x3b8   :  { %1464 = vmatpush3.bf16.msra.mxu1 %v1619_v28 }
 0x3b9   :  { %1465 = vmatprep.subr.bf16.mxu1 %v1520_v2 }
 0x3bc   :  { %1467 = vmatpush3.bf16.msra.mxu1 %v1635_v34 }
 0x3bd   :  { %1468 = vmatprep.subr.bf16.mxu1 %v1520_v2 }
 0x3c0   :  { %1470 = vmatpush3.bf16.msra.mxu1 %v1651_v40 }
 0x3c1   :  { %1471 = vmatprep.subr.bf16.mxu1 %v1520_v2 }
 0x3c4   :  { %1473 = vmatpush3.bf16.msra.mxu1 %v1667_v46 }
 0x3c5   :  { %1474 = vmatprep.subr.bf16.mxu1 %v1520_v2 }
 0x3c8   :  { %1476 = vmatpush3.bf16.msra.mxu1 %v1677_v50 }
 0x47e   :  { %v560_v30 = vpop.f32.mrb[4].mxu1 }
 0x47f   :  { %v561_v31 = vadd.f32 %v560_v30, %v162_v29  ;;  %v1171_v32 = vpop.f32.mrb[5].mxu1 }
 0x481   :  { %1512 = vtanh.f32 %v561_v31 }
 0x48b   :  { %v1513_v33 = vpop.eup %1512 }
 0x48c   :  { %1205 = vmatmul.mubr.f32.vlgmr.msra.gmra.mrb[12].mxu0 %v1513_v33 }
 0x48d   :  { %1479 = vmatpush3.bf16.msra.mxu0 %v1569_v9  ;;  %1274 = vmatprep.mubr.msk.f32.mxu0 %vm1521_vm0, %v1522_v4  ;;  %v167_v4 = vadd.f32 %v1765_v6, %v1744_v58 }
 0x48e   :  { %1480 = vmatprep.subr.bf16.mxu0 %v1520_v2 }
 0x491   :  { %1482 = vmatpush3.bf16.msra.mxu0 %v1584_v15 }
 0x492   :  { %1483 = vmatprep.subr.bf16.mxu0 %v1520_v2 }
 0x495   :  { %1485 = vmatpush3.bf16.msra.mxu0 %v1600_v21 }
 0x496   :  { %1486 = vmatprep.subr.bf16.mxu0 %v1520_v2 }
 0x499   :  { %1488 = vmatpush3.bf16.msra.mxu0 %v1619_v28 }
 0x49a   :  { %1489 = vmatprep.subr.bf16.mxu0 %v1520_v2 }
 0x49d   :  { %1491 = vmatpush3.bf16.msra.mxu0 %v1635_v34  ;;  %v172_v34 = vadd.f32 %v1744_v58, %v1771_v10 }
 0x49e   :  { %1492 = vmatprep.subr.bf16.mxu0 %v1520_v2 }
 0x4a1   :  { %1494 = vmatpush3.bf16.msra.mxu0 %v1651_v40 }
 0x4a2   :  { %1495 = vmatprep.subr.bf16.mxu0 %v1520_v2 }
 0x4a5   :  { %1497 = vmatpush3.bf16.msra.mxu0 %v1667_v46 }
 0x4a6   :  { %1498 = vmatprep.subr.bf16.mxu0 %v1520_v2  ;;  %v177_v2 = vadd.f32 %v1769_v8, %v1744_v58 }
 0x4a9   :  { %1500 = vmatpush3.bf16.msra.mxu0 %v1677_v50 }
 0x55f   :  { %v632_v9 = vpop.f32.mrb[12].mxu0 }
 0x560   :  { %v633_v15 = vadd.f32 %v632_v9, %v167_v4  ;;  %v1206_v21 = vpop.f32.mrb[13].mxu0 }
 0x562   :  { %1514 = vtanh.f32 %v633_v15 }
 0x56c   :  { %v1515_v28 = vpop.eup %1514 }
 0x56d   :  { %1240 = vmatmul.mubr.f32.vlgmr.msra.gmra.mrb[6].mxu1 %v1515_v28 }
 0x640   :  { %v704_v35 = vpop.f32.mrb[6].mxu1 }
 0x641   :  { %v705_v36 = vadd.f32 %v704_v35, %v172_v34  ;;  %v1241_v37 = vpop.f32.mrb[7].mxu1 }
 0x643   :  { %1516 = vtanh.f32 %v705_v36 }
 0x64d   :  { %v1517_v38 = vpop.eup %1516 }
 0x64e   :  { %1275 = vmatmul.mubr.f32.vlgmr.msra.gmra.mrb[14].mxu0 %v1517_v38 }
 0x721   :  { %v776_v39 = vpop.f32.mrb[14].mxu0 }
 0x722   :  { %v777_v40 = vadd.f32 %v776_v39, %v177_v2  ;;  %v1276_v41 = vpop.f32.mrb[15].mxu0 }
 0x724   :  { %1518 = vtanh.f32 %v777_v40 }
 0x72e   :  { %v1519_v42 = vpop.eup %1518 }
 0x72f   :  { %781 = vst [vmem:[%s1861_s4] sm:$0xff] %v1519_v42 }

</bundles_post_ra>
